<compile_context>
chip_gen: v6e
topology: v6e:2x2x1
jax: 0.10.0
libtpu: 0.0.40
codegen_flags: <defaults>
</compile_context>

<pallas_src>
import jax
import jax.numpy as jnp
from jax.experimental import pallas as pl
from jax.experimental.pallas import tpu as pltpu


def _round_up(x, m):
    return ((x + m - 1) // m) * m


# ----------------------------------------------------------------------------
# Kernels
# ----------------------------------------------------------------------------
def _skip_linear_kernel(alpha_ref, x_old_ref, w_ref, b_ref, x_new_ref, out_ref):
    # alpha_ref: SMEM (1,) f32 scalar
    # x_old_ref: [TM, in_dim]   VMEM streamed tile
    # w_ref:     [in_dim, TN]   VMEM resident tile (pre-transposed, bf16)
    # b_ref:     [1, TN]        VMEM resident tile (f32)
    # x_new_ref: [TM, TN]       VMEM streamed tile
    # out_ref:   [TM, TN]       VMEM streamed tile
    a = alpha_ref[0]
    x = x_old_ref[...]
    if x.dtype != w_ref.dtype:
        x = x.astype(w_ref.dtype)           # MXU operands in bf16 (free VPU cast)
    y = jnp.dot(x, w_ref[...], preferred_element_type=jnp.float32)   # f32 accumulate
    y = y + b_ref[...].astype(jnp.float32)
    blended = a * y + (1.0 - a) * x_new_ref[...].astype(jnp.float32)  # f32 blend
    out_ref[...] = blended.astype(out_ref.dtype)


def _blend_kernel(alpha_ref, x_old_ref, x_new_ref, out_ref):
    # Identity-transform branch: alpha * x_old + (1 - alpha) * x_new.
    a = alpha_ref[0]
    blended = (a * x_old_ref[...].astype(jnp.float32)
               + (1.0 - a) * x_new_ref[...].astype(jnp.float32))
    out_ref[...] = blended.astype(out_ref.dtype)


# ----------------------------------------------------------------------------
# Generation-aware VMEM budgeting and tile selection
# ----------------------------------------------------------------------------
def _vmem_budget():
    """Return (vmem_limit_bytes for CompilerParams, tiling budget bytes)."""
    cap = 64 * 1024 * 1024                      # conservative default (v7x-sized)
    try:
        cap = int(pltpu.get_tpu_info().vmem_capacity_bytes)
    except Exception:
        pass
    if cap >= 100 * 1024 * 1024:                # v5e / v6e: 128 MiB VMEM per core
        return 104 * 1024 * 1024, 80 * 1024 * 1024
    return 46 * 1024 * 1024, 32 * 1024 * 1024   # v7x: 64 MiB VMEM per core


def _round_tm(tm, M):
    tm = int(min(tm, 1024, _round_up(M, 8)))
    if tm >= 256:
        tm = (tm // 256) * 256        # full-height passes on the 256-wide MXU
    else:
        tm = max(8, (tm // 8) * 8)    # sublane multiple
    return tm


def _choose_tiles(M, in_dim, out_dim, xo_b, xn_b, w_b, budget):
    """Pick (TM, TN, grid_m, grid_n) from a VMEM tiling budget."""
    out_b = xn_b
    # N (output-feature) tile: keep the resident, single-buffered weight tile
    # within half the budget.  Common case: fully resident (TN = out_dim).
    if out_dim < 128 or in_dim * out_dim * w_b <= budget // 2:
        TN = out_dim
    else:
        tn = (budget // 2) // max(in_dim * w_b, 1)
        tn = max(128, min(1024, (tn // 128) * 128))
        TN = min(tn, (out_dim // 128) * 128)
    grid_n = pl.cdiv(out_dim, TN)

    # M (row) tile: double-buffered x_old / x_new / out streams fill the rest.
    w_resident = in_dim * TN * w_b + TN * 4          # weight + bias (1x buffered)
    per_row = 2 * (in_dim * xo_b + TN * (xn_b + out_b))
    tm = max(budget - w_resident, 0) // max(per_row, 1)
    TM = _round_tm(tm, M)
    grid_m = pl.cdiv(M, TM)
    return TM, TN, grid_m, grid_n


def _choose_blend_tm(M, dim, xo_b, xn_b, budget):
    per_row = 2 * dim * (xo_b + 2 * xn_b)            # x_old + x_new + out, 2x buffered
    return _round_tm(budget // max(per_row, 1), M)


# ----------------------------------------------------------------------------
# Wrapper
# ----------------------------------------------------------------------------
def skip_connection(x_old, x_new, weight=None, bias=None, alpha=1.0, *,
                    matmul_dtype=jnp.bfloat16):
    """alpha * transform(x_old) + (1 - alpha) * x_new.

    x_old:  [B, S, in_dim]
    x_new:  [B, S, out_dim]
    weight: [out_dim, in_dim] (PyTorch nn.Linear layout) or None for Identity
    bias:   [out_dim] or None
    alpha:  scalar (shape (1,) like the PyTorch Parameter)
    """
    B, S, in_dim = x_old.shape
    out_dim = x_new.shape[-1]
    M = B * S

    vmem_limit, budget = _vmem_budget()
    alpha_1d = jnp.asarray(alpha, jnp.float32).reshape(1)
    x_new_2d = x_new.reshape(M, out_dim)             # metadata-only reshape

    # ---------------- Identity branch (in_dim == out_dim in the module) -----
    if weight is None:
        assert in_dim == out_dim, "Identity transform requires in_dim == out_dim"
        x_old_2d = x_old.reshape(M, in_dim)
        TM = _choose_blend_tm(M, out_dim, x_old_2d.dtype.itemsize,
                              x_new_2d.dtype.itemsize, budget)
        out_2d = pl.pallas_call(
            _blend_kernel,
            out_shape=jax.ShapeDtypeStruct((M, out_dim), x_new_2d.dtype),
            grid=(pl.cdiv(M, TM),),
            in_specs=[
                pl.BlockSpec(memory_space=pltpu.SMEM),            # alpha
                pl.BlockSpec((TM, out_dim), lambda i: (i, 0)),    # x_old rows
                pl.BlockSpec((TM, out_dim), lambda i: (i, 0)),    # x_new rows
            ],
            out_specs=pl.BlockSpec((TM, out_dim), lambda i: (i, 0)),
            compiler_params=pltpu.CompilerParams(
                dimension_semantics=("parallel",),
                vmem_limit_bytes=vmem_limit),
        )(alpha_1d, x_old_2d, x_new_2d)
        return out_2d.reshape(B, S, out_dim)

    # ---------------- Linear branch: x_old @ W.T + b ------------------------
    out_dim = weight.shape[0]
    x_old_2d = x_old.reshape(M, in_dim)              # metadata-only reshape
    # One-time, small weight prep: pre-transpose to [in_dim, out_dim] (no
    # per-tile transpose in the kernel), bf16 for the MXU / half resident VMEM.
    w_t = weight.T.astype(matmul_dtype)
    bias_2d = bias.reshape(1, out_dim).astype(jnp.float32)

    TM, TN, grid_m, grid_n = _choose_tiles(
        M, in_dim, out_dim,
        x_old_2d.dtype.itemsize, x_new_2d.dtype.itemsize, w_t.dtype.itemsize,
        budget)

    def run(single_buffer_w):
        w_pm = {"pipeline_mode": pl.Buffered(1)} if single_buffer_w else {}
        in_specs = [
            pl.BlockSpec(memory_space=pltpu.SMEM),                     # alpha
            pl.BlockSpec((TM, in_dim), lambda j, i: (i, 0)),           # x_old rows
            pl.BlockSpec((in_dim, TN), lambda j, i: (0, j), **w_pm),   # W_t (resident)
            pl.BlockSpec((1, TN), lambda j, i: (0, j), **w_pm),        # bias (resident)
            pl.BlockSpec((TM, TN), lambda j, i: (i, j)),               # x_new rows
        ]
        return pl.pallas_call(
            _skip_linear_kernel,
            out_shape=jax.ShapeDtypeStruct((M, out_dim), x_new_2d.dtype),
            # N outer (W tile changes rarely / never), M inner (streamed rows).
            grid=(grid_n, grid_m),
            in_specs=in_specs,
            out_specs=pl.BlockSpec((TM, TN), lambda j, i: (i, j)),
            compiler_params=pltpu.CompilerParams(
                dimension_semantics=("parallel", "parallel"),
                vmem_limit_bytes=vmem_limit),
        )(alpha_1d, x_old_2d, w_t, bias_2d, x_new_2d)

    try:
        out_2d = run(hasattr(pl, "Buffered"))
    except Exception:
        # Older JAX without per-BlockSpec pipeline_mode: fall back to the
        # default (double-buffered) weight/bias specs.
        out_2d = run(False)

    return out_2d.reshape(B, S, out_dim)


# ----------------------------------------------------------------------------
# Demo / correctness check
# ----------------------------------------------------------------------------
if __name__ == "__main__":
    key = jax.random.PRNGKey(0)
    k_xo, k_xn, k_w, k_b, k_xi = jax.random.split(key, 5)

    B, S = 2, 8
    in_dim, out_dim = 32, 64  # in_dim != out_dim -> transform is a Linear

    x_old = jax.random.normal(k_xo, (B, S, in_dim), dtype=jnp.float32)
    x_new = jax.random.normal(k_xn, (B, S, out_dim), dtype=jnp.float32)

    # Deterministic parameter init (nn.Linear shapes; not a checkpoint load).
    bound = 1.0 / (in_dim ** 0.5)
    weight = jax.random.uniform(k_w, (out_dim, in_dim), jnp.float32, -bound, bound)
    bias = jax.random.uniform(k_b, (out_dim,), jnp.float32, -bound, bound)
    # alpha is initialized to ones(1) in the module; use a non-trivial value so
    # both branches of the blend are exercised.
    alpha = jnp.array([0.7], dtype=jnp.float32)

    out = skip_connection(x_old, x_new, weight, bias, alpha)
    out = jax.block_until_ready(out)

    # Pure-JAX (f32) reference; kernel matmul runs in bf16 with f32 accumulate,
    # so use a bf16-appropriate tolerance.
    ref = alpha[0] * (x_old @ weight.T + bias) + (1.0 - alpha[0]) * x_new
    assert out.shape == (B, S, out_dim)
    assert jnp.allclose(out, ref, atol=5e-2, rtol=5e-2), "mismatch vs reference (linear)"

    # Identity branch (in_dim == out_dim -> nn.Identity).
    x_old_id = jax.random.normal(k_xi, (B, S, out_dim), dtype=jnp.float32)
    out_id = jax.block_until_ready(skip_connection(x_old_id, x_new, None, None, alpha))
    ref_id = alpha[0] * x_old_id + (1.0 - alpha[0]) * x_new
    assert jnp.allclose(out_id, ref_id, atol=1e-5, rtol=1e-5), "mismatch vs reference (identity)"

    print("KERNEL_OK")
</pallas_src>

<mosaic_0001>
module attributes {stable_mosaic.version = 11 : i64} {
  func.func @_skip_linear_kernel(%arg0: i32, %arg1: i32, %arg2: memref<1xf32, #tpu.memory_space<smem>>, %arg3: memref<16x32xf32, #tpu.memory_space<vmem>>, %arg4: memref<32x64xbf16, #tpu.memory_space<vmem>>, %arg5: memref<1x64xf32, #tpu.memory_space<vmem>>, %arg6: memref<16x64xf32, #tpu.memory_space<vmem>>, %arg7: memref<16x64xf32, #tpu.memory_space<vmem>>) attributes {dimension_semantics = [#tpu.dimension_semantics<parallel>, #tpu.dimension_semantics<parallel>], iteration_bounds = array<i64: 1, 1>, scalar_prefetch = 0 : i64, scratch_operands = 0 : i64, tpu.core_type = #tpu.core_type<tc>, window_params = [{transform_indices = @transform_0, window_bounds = array<i64: 1>}, {transform_indices = @transform_1, window_bounds = array<i64: 16, 32>}, {pipeline_mode = #tpu.pipeline_mode<synchronous>, transform_indices = @transform_2, window_bounds = array<i64: 32, 64>}, {pipeline_mode = #tpu.pipeline_mode<synchronous>, transform_indices = @transform_3, window_bounds = array<i64: 1, 64>}, {transform_indices = @transform_4, window_bounds = array<i64: 16, 64>}, {transform_indices = @transform_5, window_bounds = array<i64: 16, 64>}]} {
    %c0 = arith.constant 0 : index
    %0 = memref.load %arg2[%c0] : memref<1xf32, #tpu.memory_space<smem>>
    %c0_0 = arith.constant 0 : index
    %c0_1 = arith.constant 0 : index
    %1 = vector.load %arg3[%c0_0, %c0_1] : memref<16x32xf32, #tpu.memory_space<vmem>>, vector<16x32xf32>
    %2 = arith.truncf %1 : vector<16x32xf32> to vector<16x32xbf16>
    %c0_2 = arith.constant 0 : index
    %c0_3 = arith.constant 0 : index
    %3 = vector.load %arg4[%c0_2, %c0_3] : memref<32x64xbf16, #tpu.memory_space<vmem>>, vector<32x64xbf16>
    %cst = arith.constant dense<0.000000e+00> : vector<16x64xf32>
    %4 = tpu.matmul %2, %3, %cst {dimension_numbers = #tpu.dot_dimension_numbers<[1], [0], [0], [1], [0, 0, 1, 1], [], []>} : vector<16x32xbf16>, vector<32x64xbf16>, vector<16x64xf32> -> vector<16x64xf32>
    %c0_4 = arith.constant 0 : index
    %c0_5 = arith.constant 0 : index
    %5 = vector.load %arg5[%c0_4, %c0_5] : memref<1x64xf32, #tpu.memory_space<vmem>>, vector<1x64xf32>
    %6 = vector.broadcast %5 : vector<1x64xf32> to vector<16x64xf32>
    %7 = arith.addf %4, %6 : vector<16x64xf32>
    %8 = vector.broadcast %0 : f32 to vector<16x64xf32>
    %9 = arith.mulf %8, %7 : vector<16x64xf32>
    %cst_6 = arith.constant 1.000000e+00 : f32
    %10 = arith.subf %cst_6, %0 : f32
    %c0_7 = arith.constant 0 : index
    %c0_8 = arith.constant 0 : index
    %11 = vector.load %arg6[%c0_7, %c0_8] : memref<16x64xf32, #tpu.memory_space<vmem>>, vector<16x64xf32>
    %12 = vector.broadcast %10 : f32 to vector<16x64xf32>
    %13 = arith.mulf %12, %11 : vector<16x64xf32>
    %14 = arith.addf %9, %13 : vector<16x64xf32>
    %c0_9 = arith.constant 0 : index
    %c0_10 = arith.constant 0 : index
    %15 = vector.load %arg7[%c0_9, %c0_10] : memref<16x64xf32, #tpu.memory_space<vmem>>, vector<16x64xf32>
    tpu.vector_store %arg7[%c0_9, %c0_10], %14 {strides = array<i32>} : memref<16x64xf32, #tpu.memory_space<vmem>>, vector<16x64xf32>,
    return
  }
  func.func @transform_0(%arg0: i32, %arg1: i32) -> i32 {
    %c0_i32 = arith.constant 0 : i32
    %c0_i32_0 = arith.constant 0 : i32
    return %c0_i32 : i32
  }
  func.func @transform_1(%arg0: i32, %arg1: i32) -> (i32, i32) {
    %c0_i32 = arith.constant 0 : i32
    %c0_i32_0 = arith.constant 0 : i32
    return %arg1, %c0_i32 : i32, i32
  }
  func.func @transform_2(%arg0: i32, %arg1: i32) -> (i32, i32) {
    %c0_i32 = arith.constant 0 : i32
    %c0_i32_0 = arith.constant 0 : i32
    return %c0_i32, %arg0 : i32, i32
  }
  func.func @transform_3(%arg0: i32, %arg1: i32) -> (i32, i32) {
    %c0_i32 = arith.constant 0 : i32
    %c0_i32_0 = arith.constant 0 : i32
    return %c0_i32, %arg0 : i32, i32
  }
  func.func @transform_4(%arg0: i32, %arg1: i32) -> (i32, i32) {
    %c0_i32 = arith.constant 0 : i32
    return %arg1, %arg0 : i32, i32
  }
  func.func @transform_5(%arg0: i32, %arg1: i32) -> (i32, i32) {
    %c0_i32 = arith.constant 0 : i32
    return %arg1, %arg0 : i32, i32
  }
}

module attributes {stable_mosaic.version = 11 : i64} {
  func.func @_skip_linear_kernel(%arg0: i32, %arg1: i32, %arg2: memref<1xf32, #tpu.memory_space<smem>>, %arg3: memref<16x32xf32, #tpu.memory_space<vmem>>, %arg4: memref<32x64xbf16, #tpu.memory_space<vmem>>, %arg5: memref<1x64xf32, #tpu.memory_space<vmem>>, %arg6: memref<16x64xf32, #tpu.memory_space<vmem>>, %arg7: memref<16x64xf32, #tpu.memory_space<vmem>>) attributes {dimension_semantics = [#tpu.dimension_semantics<parallel>, #tpu.dimension_semantics<parallel>], iteration_bounds = array<i64: 1, 1>, scalar_prefetch = 0 : i64, scratch_operands = 0 : i64, tpu.core_type = #tpu.core_type<tc>, window_params = [{transform_indices = @transform_0, window_bounds = array<i64: 1>}, {transform_indices = @transform_1, window_bounds = array<i64: 16, 32>}, {transform_indices = @transform_2, window_bounds = array<i64: 32, 64>}, {transform_indices = @transform_3, window_bounds = array<i64: 1, 64>}, {transform_indices = @transform_4, window_bounds = array<i64: 16, 64>}, {transform_indices = @transform_5, window_bounds = array<i64: 16, 64>}]} {
    %c0 = arith.constant 0 : index
    %0 = memref.load %arg2[%c0] : memref<1xf32, #tpu.memory_space<smem>>
    %c0_0 = arith.constant 0 : index
    %c0_1 = arith.constant 0 : index
    %1 = vector.load %arg3[%c0_0, %c0_1] : memref<16x32xf32, #tpu.memory_space<vmem>>, vector<16x32xf32>
    %2 = arith.truncf %1 : vector<16x32xf32> to vector<16x32xbf16>
    %c0_2 = arith.constant 0 : index
    %c0_3 = arith.constant 0 : index
    %3 = vector.load %arg4[%c0_2, %c0_3] : memref<32x64xbf16, #tpu.memory_space<vmem>>, vector<32x64xbf16>
    %cst = arith.constant dense<0.000000e+00> : vector<16x64xf32>
    %4 = tpu.matmul %2, %3, %cst {dimension_numbers = #tpu.dot_dimension_numbers<[1], [0], [0], [1], [0, 0, 1, 1], [], []>} : vector<16x32xbf16>, vector<32x64xbf16>, vector<16x64xf32> -> vector<16x64xf32>
    %c0_4 = arith.constant 0 : index
    %c0_5 = arith.constant 0 : index
    %5 = vector.load %arg5[%c0_4, %c0_5] : memref<1x64xf32, #tpu.memory_space<vmem>>, vector<1x64xf32>
    %6 = vector.broadcast %5 : vector<1x64xf32> to vector<16x64xf32>
    %7 = arith.addf %4, %6 : vector<16x64xf32>
    %8 = vector.broadcast %0 : f32 to vector<16x64xf32>
    %9 = arith.mulf %8, %7 : vector<16x64xf32>
    %cst_6 = arith.constant 1.000000e+00 : f32
    %10 = arith.subf %cst_6, %0 : f32
    %c0_7 = arith.constant 0 : index
    %c0_8 = arith.constant 0 : index
    %11 = vector.load %arg6[%c0_7, %c0_8] : memref<16x64xf32, #tpu.memory_space<vmem>>, vector<16x64xf32>
    %12 = vector.broadcast %10 : f32 to vector<16x64xf32>
    %13 = arith.mulf %12, %11 : vector<16x64xf32>
    %14 = arith.addf %9, %13 : vector<16x64xf32>
    %c0_9 = arith.constant 0 : index
    %c0_10 = arith.constant 0 : index
    %15 = vector.load %arg7[%c0_9, %c0_10] : memref<16x64xf32, #tpu.memory_space<vmem>>, vector<16x64xf32>
    tpu.vector_store %arg7[%c0_9, %c0_10], %14 {strides = array<i32>} : memref<16x64xf32, #tpu.memory_space<vmem>>, vector<16x64xf32>,
    return
  }
  func.func @transform_0(%arg0: i32, %arg1: i32) -> i32 {
    %c0_i32 = arith.constant 0 : i32
    %c0_i32_0 = arith.constant 0 : i32
    return %c0_i32 : i32
  }
  func.func @transform_1(%arg0: i32, %arg1: i32) -> (i32, i32) {
    %c0_i32 = arith.constant 0 : i32
    %c0_i32_0 = arith.constant 0 : i32
    return %arg1, %c0_i32 : i32, i32
  }
  func.func @transform_2(%arg0: i32, %arg1: i32) -> (i32, i32) {
    %c0_i32 = arith.constant 0 : i32
    %c0_i32_0 = arith.constant 0 : i32
    return %c0_i32, %arg0 : i32, i32
  }
  func.func @transform_3(%arg0: i32, %arg1: i32) -> (i32, i32) {
    %c0_i32 = arith.constant 0 : i32
    %c0_i32_0 = arith.constant 0 : i32
    return %c0_i32, %arg0 : i32, i32
  }
  func.func @transform_4(%arg0: i32, %arg1: i32) -> (i32, i32) {
    %c0_i32 = arith.constant 0 : i32
    return %arg1, %arg0 : i32, i32
  }
  func.func @transform_5(%arg0: i32, %arg1: i32) -> (i32, i32) {
    %c0_i32 = arith.constant 0 : i32
    return %arg1, %arg0 : i32, i32
  }
}

</mosaic_0001>

<bundles_post_ra>
// kernel: tpu_custom_call.1
= control target key start
LH: loop header
LB: loop body
LE: loop exit
PB: predicated region body
PF: predicated region fallthrough
CT: control target
= control target key end

     0   :  { %11 = vsyncpa [#allocation4], 0  ;;  %s351_s0 = inlined_call_operand.<no memory space> [shape: f32[1], index: 0, kind: input, shape index: {}]   ;;  %s352_s1 = inlined_call_operand.hbm [shape: f32[16,32], index: 1, kind: input, shape index: {}]   ;;  %s353_s2 = inlined_call_operand.hbm [shape: bf16[32,64], index: 2, kind: input, shape index: {}]   ;;  %s354_s3 = inlined_call_operand.vmem [shape: f32[1,64], index: 3, kind: input, shape index: {}]   ;;  %s355_s4 = inlined_call_operand.hbm [shape: f32[16,64], index: 4, kind: input, shape index: {}]   ;;  %s356_s5 = inlined_call_operand.hbm [shape: f32[16,64], index: 5, kind: output, shape index: {}]  }
   0x1   :  { %12 = vsyncpa [#allocation7], 0 }
   0x2   :  { %13 = vsyncpa [#allocation5], 0  ;;  %s281_s18 = smov [#allocation6]  }
   0x3   :  { %s33_s19 = sshll.u32 %s281_s18, 4  ;;  %s34_s19 = int_to_ptr.vmem [resolvable:$true] %s33_s19 }
   0x4   :  { %s203_s20 = scalar_lea.vmem %s34_s19, 256  ;;  %p208_p1 = scmp.lt.s32.totalorder %s34_s19, %s34_s19 }
   0x5   :  { %p204_p0 = scmp.ne.s32.totalorder %s34_s19, %s203_s20  ;;  %p209_p2 = scmp.lt.s32.totalorder %s203_s20, %s203_s20 }
   0x7   :  { %p210_p3 = por %p209_p2, %p208_p1 }
   0x9   :  { %p211_p4 = pnand %p210_p3, %p204_p0 }
   0xb   :  { %214 = shalt.err (!%p211_p4)
}
   0xc   :  { %s282_s21 = smov 64   ;;  %s283_s22 = smov 4  }
   0xd   :  { %39 = dma.hbm_to_vmem [thread:$0]  %s353_s2, 256, %s34_s19, [#allocation7], %s282_s21, %s282_s21, %s283_s22  }
   0xe   :  { %s284_s25 = smov [#allocation3]  }
   0xf   :  { %s21_s26 = sshll.u32 %s284_s25, 4  ;;  %s22_s26 = int_to_ptr.vmem [resolvable:$true] %s21_s26 }
  0x10   :  { %s223_s27 = scalar_lea.vmem %s22_s26, 256  ;;  %p228_p6 = scmp.lt.s32.totalorder %s22_s26, %s22_s26 }
  0x11   :  { %p224_p5 = scmp.ne.s32.totalorder %s22_s26, %s223_s27  ;;  %p229_p7 = scmp.lt.s32.totalorder %s223_s27, %s223_s27 }
  0x13   :  { %p230_p8 = por %p229_p7, %p228_p6 }
  0x15   :  { %p231_p9 = pnand %p230_p8, %p224_p5 }
  0x17   :  { %234 = shalt.err (!%p231_p9)
}
  0x18   :  { %s285_s28 = smov 128   ;;  %s286_s29 = smov 8  }
  0x19   :  { %27 = dma.hbm_to_vmem [thread:$0]  %s352_s1, 256, %s22_s26, [#allocation4], %s285_s28, %s285_s28, %s286_s29  }
  0x1a   :  { %s287_s2 = smov [#allocation8]  }
  0x1b   :  { %s47_s7 = sshll.u32 %s287_s2, 4  ;;  %s48_s7 = int_to_ptr.vmem [resolvable:$true] %s47_s7 }
  0x1c   :  { %s243_s8 = scalar_lea.vmem %s48_s7, 256  ;;  %p248_p11 = scmp.lt.s32.totalorder %s48_s7, %s48_s7 }
  0x1d   :  { %p244_p10 = scmp.ne.s32.totalorder %s48_s7, %s243_s8  ;;  %p249_p12 = scmp.lt.s32.totalorder %s243_s8, %s243_s8 }
  0x1f   :  { %p250_p13 = por %p249_p12, %p248_p11 }
  0x21   :  { %p251_p0 = pnand %p250_p13, %p244_p10 }
  0x23   :  { %254 = shalt.err (!%p251_p0)
}
  0x24   :  { %53 = dma.hbm_to_vmem [thread:$0]  %s355_s4, 256, %s48_s7, [#allocation7], %s285_s28, %s285_s28, %s286_s29  }
  0x25   :  { %275 = dma.done.wait [#allocation4], 256  }
  0x26   :  { %276 = vsyncadd [#allocation4], 4294967040 }
  0x27   :  { %277 = dma.done.wait [#allocation7], 512  }
  0x28   :  { %278 = vsyncadd [#allocation7], 4294966784  ;;  %v288_v0 = vmov 0.0   ;;  %vm289_vm0 = vmmov 0   ;;  %v193_v1 = vld [vmem:[#allocation6 + $0x8] sm:$0xff]   ;;  %v194_v2 = vld [vmem:[#allocation6] sm:$0xff]   ;;  %v136_v10 = vstv %s351_s0 }
  0x29   :  { %175 = vmatprep.subr.bf16.mxu0 %v288_v0  ;;  %179 = vmatprep.mubr.msk.bf16.mxu0 %vm289_vm0, %v288_v0  ;;  %v65_v3 = vld [vmem:[#allocation3] sm:$0xff]  ;;  %v66_v4 = vld [vmem:[#allocation3 + $0x8] sm:$0xff]  ;;  %vm91_vm1 = vcmask 261120   ;;  %s139_s11 = ssub.f32 1.0, %s351_s0  ;;  %vm147_vm2 = vcmask 523264   ;;  %s290_s16 = smov [#allocation9]  }
  0x2a   :  { %176 = vmatpush3.bf16.msra.mxu0 %v193_v1  ;;  %v67_v5 = vpack.c.bf16 %v66_v4, %v65_v3  ;;  %v168_v6 = vld [vmem:[%s354_s3] ss:$0 sm:$0xff]  ;;  %v141_v14 = vld [vmem:[#allocation8 + $0x8] sm:$0xff]  ;;  %s155_s3 = sshll.u32 %s290_s16, 4  ;;  %s156_s3 = int_to_ptr.vmem [resolvable:$true] %s155_s3 }
  0x2b   :  { %177 = vmatprep.subr.bf16.mxu0 %v288_v0  ;;  %v140_v7 = vld [vmem:[#allocation8] sm:$0xff]  ;;  %v142_v8 = vstv %s139_s11  ;;  %s255_s17 = scalar_lea.vmem %s156_s3, 256  ;;  %p260_p2 = scmp.lt.s32.totalorder %s156_s3, %s156_s3 }
  0x2c   :  { %v143_v12 = vmul.f32 %v142_v8, %v140_v7  ;;  %v144_v19 = vmul.f32 %v142_v8, %v141_v14  ;;  %p256_p1 = scmp.ne.s32.totalorder %s156_s3, %s255_s17  ;;  %p261_p3 = scmp.lt.s32.totalorder %s255_s17, %s255_s17 }
  0x2e   :  { %178 = vmatpush3.bf16.msra.mxu0 %v194_v2  ;;  %p262_p4 = por %p261_p3, %p260_p2 }
  0x30   :  { %p263_p5 = pnand %p262_p4, %p256_p1 }
  0x31   :  { %180 = vmatmul.mubr.msk.bf16.vlgmr.msra.gmra.mxu0 %vm91_vm1, %v67_v5 }
  0xf1   :  { %v129_v9 = vpop.f32.mrf.mxu0 }
  0xf2   :  { %v130_v11 = vadd.f32 %v168_v6, %v129_v9 }
  0xf3   :  { %v181_v13 = vpop.f32.mrf.mxu0 }
  0xf4   :  { %v137_v15 = vmul.f32 %v136_v10, %v130_v11 }
  0xf5   :  { %v132_v16 = vpop.f32.mrf.mxu0 }
  0xf6   :  { %v145_v17 = vadd.f32 %v143_v12, %v137_v15  ;;  %v133_v18 = vadd.f32 %v168_v6, %v132_v16 }
  0xf7   :  { %v182_v20 = vpop.f32.mrf.mxu0 }
  0xf8   :  { %v138_v21 = vmul.f32 %v136_v10, %v133_v18  ;;  %148 = vst.msk [vmem:[#allocation9] sm:$0xff] %vm147_vm2, %v145_v17 }
  0xfa   :  { %v146_v22 = vadd.f32 %v144_v19, %v138_v21 }
  0xfc   :  { %149 = vst.msk [vmem:[#allocation9 + $0x8] sm:$0xff] %vm147_vm2, %v146_v22 }
  0xfd   :  { %266 = shalt.err (!%p263_p5)
}
  0xfe   :  { %161 = dma.vmem_to_hbm [thread:$0]  %s156_s3, 256, %s356_s5, [#allocation5], %s285_s28, %s285_s28, %s286_s29  }
  0xff   :  { %279 = dma.done.wait [#allocation5], 256  }
 0x100   :  { %280 = vsyncadd [#allocation5], 4294967040 }
 0x101   :  { %165 = vsyncpa [#allocation4], 1 }
 0x102   :  { %166 = vsyncpa [#allocation7], 1 }
 0x103   :  { %167 = vsyncpa [#allocation5], 1 }

// kernel: tpu_custom_call.1
= control target key start
LH: loop header
LB: loop body
LE: loop exit
PB: predicated region body
PF: predicated region fallthrough
CT: control target
= control target key end

     0   :  { %11 = vsyncpa [#allocation4], 0  ;;  %s351_s0 = inlined_call_operand.<no memory space> [shape: f32[1], index: 0, kind: input, shape index: {}]   ;;  %s352_s1 = inlined_call_operand.hbm [shape: f32[16,32], index: 1, kind: input, shape index: {}]   ;;  %s353_s2 = inlined_call_operand.hbm [shape: bf16[32,64], index: 2, kind: input, shape index: {}]   ;;  %s354_s3 = inlined_call_operand.vmem [shape: f32[1,64], index: 3, kind: input, shape index: {}]   ;;  %s355_s4 = inlined_call_operand.hbm [shape: f32[16,64], index: 4, kind: input, shape index: {}]   ;;  %s356_s5 = inlined_call_operand.hbm [shape: f32[16,64], index: 5, kind: output, shape index: {}]  }
   0x1   :  { %12 = vsyncpa [#allocation7], 0 }
   0x2   :  { %13 = vsyncpa [#allocation5], 0  ;;  %s281_s18 = smov [#allocation6]  }
   0x3   :  { %s33_s19 = sshll.u32 %s281_s18, 4  ;;  %s34_s19 = int_to_ptr.vmem [resolvable:$true] %s33_s19 }
   0x4   :  { %s203_s20 = scalar_lea.vmem %s34_s19, 256  ;;  %p208_p1 = scmp.lt.s32.totalorder %s34_s19, %s34_s19 }
   0x5   :  { %p204_p0 = scmp.ne.s32.totalorder %s34_s19, %s203_s20  ;;  %p209_p2 = scmp.lt.s32.totalorder %s203_s20, %s203_s20 }
   0x7   :  { %p210_p3 = por %p209_p2, %p208_p1 }
   0x9   :  { %p211_p4 = pnand %p210_p3, %p204_p0 }
   0xb   :  { %214 = shalt.err (!%p211_p4)
}
   0xc   :  { %s282_s21 = smov 64   ;;  %s283_s22 = smov 4  }
   0xd   :  { %39 = dma.hbm_to_vmem [thread:$0]  %s353_s2, 256, %s34_s19, [#allocation7], %s282_s21, %s282_s21, %s283_s22  }
   0xe   :  { %s284_s25 = smov [#allocation3]  }
   0xf   :  { %s21_s26 = sshll.u32 %s284_s25, 4  ;;  %s22_s26 = int_to_ptr.vmem [resolvable:$true] %s21_s26 }
  0x10   :  { %s223_s27 = scalar_lea.vmem %s22_s26, 256  ;;  %p228_p6 = scmp.lt.s32.totalorder %s22_s26, %s22_s26 }
  0x11   :  { %p224_p5 = scmp.ne.s32.totalorder %s22_s26, %s223_s27  ;;  %p229_p7 = scmp.lt.s32.totalorder %s223_s27, %s223_s27 }
  0x13   :  { %p230_p8 = por %p229_p7, %p228_p6 }
  0x15   :  { %p231_p9 = pnand %p230_p8, %p224_p5 }
  0x17   :  { %234 = shalt.err (!%p231_p9)
}
  0x18   :  { %s285_s28 = smov 128   ;;  %s286_s29 = smov 8  }
  0x19   :  { %27 = dma.hbm_to_vmem [thread:$0]  %s352_s1, 256, %s22_s26, [#allocation4], %s285_s28, %s285_s28, %s286_s29  }
  0x1a   :  { %s287_s2 = smov [#allocation8]  }
  0x1b   :  { %s47_s7 = sshll.u32 %s287_s2, 4  ;;  %s48_s7 = int_to_ptr.vmem [resolvable:$true] %s47_s7 }
  0x1c   :  { %s243_s8 = scalar_lea.vmem %s48_s7, 256  ;;  %p248_p11 = scmp.lt.s32.totalorder %s48_s7, %s48_s7 }
  0x1d   :  { %p244_p10 = scmp.ne.s32.totalorder %s48_s7, %s243_s8  ;;  %p249_p12 = scmp.lt.s32.totalorder %s243_s8, %s243_s8 }
  0x1f   :  { %p250_p13 = por %p249_p12, %p248_p11 }
  0x21   :  { %p251_p0 = pnand %p250_p13, %p244_p10 }
  0x23   :  { %254 = shalt.err (!%p251_p0)
}
  0x24   :  { %53 = dma.hbm_to_vmem [thread:$0]  %s355_s4, 256, %s48_s7, [#allocation7], %s285_s28, %s285_s28, %s286_s29  }
  0x25   :  { %275 = dma.done.wait [#allocation4], 256  }
  0x26   :  { %276 = vsyncadd [#allocation4], 4294967040 }
  0x27   :  { %277 = dma.done.wait [#allocation7], 512  }
  0x28   :  { %278 = vsyncadd [#allocation7], 4294966784  ;;  %v288_v0 = vmov 0.0   ;;  %vm289_vm0 = vmmov 0   ;;  %v193_v1 = vld [vmem:[#allocation6 + $0x8] sm:$0xff]   ;;  %v194_v2 = vld [vmem:[#allocation6] sm:$0xff]   ;;  %v136_v10 = vstv %s351_s0 }
  0x29   :  { %175 = vmatprep.subr.bf16.mxu0 %v288_v0  ;;  %179 = vmatprep.mubr.msk.bf16.mxu0 %vm289_vm0, %v288_v0  ;;  %v65_v3 = vld [vmem:[#allocation3] sm:$0xff]  ;;  %v66_v4 = vld [vmem:[#allocation3 + $0x8] sm:$0xff]  ;;  %vm91_vm1 = vcmask 261120   ;;  %s139_s11 = ssub.f32 1.0, %s351_s0  ;;  %vm147_vm2 = vcmask 523264   ;;  %s290_s16 = smov [#allocation9]  }
  0x2a   :  { %176 = vmatpush3.bf16.msra.mxu0 %v193_v1  ;;  %v67_v5 = vpack.c.bf16 %v66_v4, %v65_v3  ;;  %v168_v6 = vld [vmem:[%s354_s3] ss:$0 sm:$0xff]  ;;  %v141_v14 = vld [vmem:[#allocation8 + $0x8] sm:$0xff]  ;;  %s155_s3 = sshll.u32 %s290_s16, 4  ;;  %s156_s3 = int_to_ptr.vmem [resolvable:$true] %s155_s3 }
  0x2b   :  { %177 = vmatprep.subr.bf16.mxu0 %v288_v0  ;;  %v140_v7 = vld [vmem:[#allocation8] sm:$0xff]  ;;  %v142_v8 = vstv %s139_s11  ;;  %s255_s17 = scalar_lea.vmem %s156_s3, 256  ;;  %p260_p2 = scmp.lt.s32.totalorder %s156_s3, %s156_s3 }
  0x2c   :  { %v143_v12 = vmul.f32 %v142_v8, %v140_v7  ;;  %v144_v19 = vmul.f32 %v142_v8, %v141_v14  ;;  %p256_p1 = scmp.ne.s32.totalorder %s156_s3, %s255_s17  ;;  %p261_p3 = scmp.lt.s32.totalorder %s255_s17, %s255_s17 }
  0x2e   :  { %178 = vmatpush3.bf16.msra.mxu0 %v194_v2  ;;  %p262_p4 = por %p261_p3, %p260_p2 }
  0x30   :  { %p263_p5 = pnand %p262_p4, %p256_p1 }
  0x31   :  { %180 = vmatmul.mubr.msk.bf16.vlgmr.msra.gmra.mxu0 %vm91_vm1, %v67_v5 }
  0xf1   :  { %v129_v9 = vpop.f32.mrf.mxu0 }
  0xf2   :  { %v130_v11 = vadd.f32 %v168_v6, %v129_v9 }
  0xf3   :  { %v181_v13 = vpop.f32.mrf.mxu0 }
  0xf4   :  { %v137_v15 = vmul.f32 %v136_v10, %v130_v11 }
  0xf5   :  { %v132_v16 = vpop.f32.mrf.mxu0 }
  0xf6   :  { %v145_v17 = vadd.f32 %v143_v12, %v137_v15  ;;  %v133_v18 = vadd.f32 %v168_v6, %v132_v16 }
  0xf7   :  { %v182_v20 = vpop.f32.mrf.mxu0 }
  0xf8   :  { %v138_v21 = vmul.f32 %v136_v10, %v133_v18  ;;  %148 = vst.msk [vmem:[#allocation9] sm:$0xff] %vm147_vm2, %v145_v17 }
  0xfa   :  { %v146_v22 = vadd.f32 %v144_v19, %v138_v21 }
  0xfc   :  { %149 = vst.msk [vmem:[#allocation9 + $0x8] sm:$0xff] %vm147_vm2, %v146_v22 }
  0xfd   :  { %266 = shalt.err (!%p263_p5)
}
  0xfe   :  { %161 = dma.vmem_to_hbm [thread:$0]  %s156_s3, 256, %s356_s5, [#allocation5], %s285_s28, %s285_s28, %s286_s29  }
  0xff   :  { %279 = dma.done.wait [#allocation5], 256  }
 0x100   :  { %280 = vsyncadd [#allocation5], 4294967040 }
 0x101   :  { %165 = vsyncpa [#allocation4], 1 }
 0x102   :  { %166 = vsyncpa [#allocation7], 1 }
 0x103   :  { %167 = vsyncpa [#allocation5], 1 }

</bundles_post_ra>
